<compile_context>
chip_gen: v5e
topology: v5e:2x2
jax: 0.10.0
libtpu: 0.0.40
codegen_flags: <defaults>
</compile_context>

<pallas_src>
import functools
import math

import numpy as np

import jax
import jax.numpy as jnp
from jax.experimental import pallas as pl
from jax.experimental.pallas import tpu as pltpu


def _vmem_capacity_bytes():
    """Physical VMEM of the local TPU generation (fallback: v7x-safe 64 MiB)."""
    try:
        return int(pltpu.get_tpu_info().vmem_capacity_bytes)
    except Exception:
        return 64 * 1024 * 1024


# ---------------------------------------------------------------------------
# Kernel A: fused projection   [p1 | p2] = x @ [W1^T | W2^T] + [0 | bias]
# ---------------------------------------------------------------------------
def _proj_kernel(x_ref, w_ref, b_ref, p1_ref, p2_ref):
    h = p1_ref.shape[-1]
    # Native-dtype MXU operands (bf16 x bf16 runs at full MXU rate), f32 accumulation.
    y = jnp.dot(x_ref[...], w_ref[...], preferred_element_type=jnp.float32) + b_ref[...]
    p1_ref[...] = y[:, :h].astype(p1_ref.dtype)          # seq @ W1^T
    p2_ref[...] = y[:, h:].astype(p2_ref.dtype)          # seq @ W2^T + bias


def _fused_projection(x2d, w12t, bias2, io_dtype, vmem_phys):
    m, h = x2d.shape
    x_isz = jnp.dtype(x2d.dtype).itemsize
    w_isz = jnp.dtype(w12t.dtype).itemsize
    io_isz = jnp.dtype(io_dtype).itemsize

    tm_cap = max(64, min(1024, (4 << 20) // max(1, h * x_isz)))
    tm = m if m <= tm_cap else (tm_cap // 8) * 8

    # VMEM need from actual block shapes (double-buffered) + f32 matmul result.
    # TODO(synk): for very large H (f32 weight ~> VMEM/4 on v7x) the grid-invariant weight
    # should get pipeline_mode=pl.Buffered(1) or a 2H-dim grid split; unnecessary here.
    need = (2 * tm * h * x_isz + 2 * h * 2 * h * w_isz + 2 * 2 * h * 4
            + 4 * tm * h * io_isz + 2 * tm * 2 * h * 4)
    vmem_limit = int(min(0.9 * vmem_phys, max(8 << 20, need + (2 << 20))))

    return pl.pallas_call(
        _proj_kernel,
        out_shape=(jax.ShapeDtypeStruct((m, h), io_dtype),
                   jax.ShapeDtypeStruct((m, h), io_dtype)),
        grid=(pl.cdiv(m, tm),),
        in_specs=[
            pl.BlockSpec((tm, h), lambda r: (r, 0)),      # x rows
            pl.BlockSpec((h, 2 * h), lambda r: (0, 0)),   # [W1^T | W2^T]  (grid-invariant)
            pl.BlockSpec((1, 2 * h), lambda r: (0, 0)),   # [0 | bias]
        ],
        out_specs=(
            pl.BlockSpec((tm, h), lambda r: (r, 0)),
            pl.BlockSpec((tm, h), lambda r: (r, 0)),
        ),
        compiler_params=pltpu.CompilerParams(
            dimension_semantics=("parallel",),
            vmem_limit_bytes=vmem_limit),
        cost_estimate=pl.CostEstimate(
            flops=2 * m * h * (2 * h),
            transcendentals=0,
            bytes_accessed=int(m * h * x_isz + 2 * h * h * w_isz + 2 * h * 4
                               + 2 * m * h * io_isz)),
    )(x2d, w12t, bias2)


# ---------------------------------------------------------------------------
# Kernel B: handshake face  y[b, i, j*H + h] = tanh(p1[b, i, h] + p2[b, j, h])
# (one grid step per useful (i_blk, j_blk) pair, block-packed lane-dense output)
# ---------------------------------------------------------------------------
def _handshake_kernel(tj, ib_ref, jb_ref, p1_ref, p2f_ref, o_ref):
    # p1_ref : (B, ti, H)      rows i of seq @ W1^T
    # p2f_ref: (B, tj*H)       rows j of seq @ W2^T + bias, j-major flattened (lane-dense)
    # o_ref  : (B, ti, tj*H)   packed output block, column index = j_local*H + h
    del ib_ref, jb_ref
    a = p1_ref[...].astype(jnp.float32)
    b = p2f_ref[...].astype(jnp.float32)
    # Replicate the i-rows along lanes (concat avoids any in-kernel reshape/relayout of the
    # large face tensor); add + tanh in f32, cast only at the store.
    a_rep = jnp.concatenate([a] * tj, axis=-1) if tj > 1 else a   # (B, ti, tj*H)
    y = jnp.tanh(a_rep + b[:, None, :])
    o_ref[...] = y.astype(o_ref.dtype)


def _pick_tiles(batch, seq, hidden, vmem_phys, tile_i=None, tile_j=None):
    """Pick (ti, tj) for the handshake face.

    Legality under the TPU (8,128) tiling rules:
      * p1  block (B, ti, H)     : ti % 8 == 0,        or ti == seq
      * p2f block (B, tj*H)      : (tj*H) % 128 == 0,  or tj == seq
      * out block (B, ti, tj*H)  : ti % 8 == 0,        or a single output block
    Budget: keep the f32 face intermediates (B*ti*tj*H*4 bytes) around VMEM/6 (generation
    aware); tj is capped at 128 and ti takes the rest of the budget (p1 stays resident per
    block-row while p2 is re-fetched, so growing ti shrinks input re-reads).
    """
    m_tj = max(8, 128 // math.gcd(hidden, 128))
    face_budget = max(1 << 20, min(vmem_phys // 6, 16 << 20))
    max_pairs = max(64, face_budget // max(1, batch * hidden * 4))

    if tile_i is None and tile_j is None and seq * seq <= max_pairs:
        return int(seq), int(seq)                        # whole face in one block (always legal)

    tj = int(tile_j) if tile_j is not None else min(128, int(max_pairs ** 0.5))
    if tj >= seq:
        tj = seq
    else:
        tj = max(m_tj, (tj // m_tj) * m_tj)
        if tj >= seq:
            tj = seq

    ti = int(tile_i) if tile_i is not None else max(8, max_pairs // max(tj, 1))
    if ti >= seq and (seq % 8 == 0 or tj >= seq):
        ti = seq
    else:
        ti = max(8, (min(ti, seq) // 8) * 8)
    return int(ti), int(tj)


def handshaking_cat(seq_hiddens, weight, bias, *, out_dtype=None, tile_i=None, tile_j=None):
    """TPLinker HandshakingKernel forward (shaking_type='cat').

    seq_hiddens: (B, S, H)
    weight:      (H, 2H)   -- torch nn.Linear(2H, H).weight layout
    bias:        (H,)
    out_dtype:   result dtype (default: seq_hiddens.dtype -> bf16 in gives bf16 out).
    returns:     (B, S*(S+1)//2, H)
    """
    B, S, H = map(int, seq_hiddens.shape)
    io_dtype = jnp.dtype(seq_hiddens.dtype)
    out_dtype = io_dtype if out_dtype is None else jnp.dtype(out_dtype)
    vmem_phys = _vmem_capacity_bytes()

    # ---- Kernel A: fused projection --------------------------------------------------
    # out = tanh(seq_i @ W1^T + seq_j @ W2^T + b), W = [W1 | W2]; both projections in one
    # (B*S, H) x (H, 2H) matmul with the bias folded into the W2 half.
    w12t = jnp.concatenate([weight[:, :H].T, weight[:, H:].T], axis=1).astype(io_dtype)
    bias2 = jnp.concatenate(
        [jnp.zeros((H,), jnp.float32), bias.astype(jnp.float32)]).reshape(1, 2 * H)

    p1, p2 = _fused_projection(seq_hiddens.reshape(B * S, H), w12t, bias2, io_dtype, vmem_phys)
    p1 = p1.reshape(B, S, H)        # row-i projection
    p2f = p2.reshape(B, S * H)      # row-j projection (+bias), j-major flattened (free reshape)

    # ---- Kernel B: upper-trapezoid handshake face -------------------------------------
    ti, tj = _pick_tiles(B, S, H, vmem_phys, tile_i, tile_j)
    gi, gj = pl.cdiv(S, ti), pl.cdiv(S, tj)

    # Enumerate only blocks containing at least one needed (j >= i) entry, i-major so the
    # p1 block stays resident (Pallas skips re-fetch when the block index is unchanged).
    useful = [(ib, jb) for ib in range(gi) for jb in range(gj) if (jb + 1) * tj > ib * ti]
    nb = len(useful)
    ib_tbl = np.asarray([u[0] for u in useful], np.int32)
    jb_tbl = np.asarray([u[1] for u in useful], np.int32)
    block_id = np.full((gi, gj), -1, np.int32)
    block_id[ib_tbl, jb_tbl] = np.arange(nb, dtype=np.int32)

    io_isz, out_isz = io_dtype.itemsize, out_dtype.itemsize
    face_f32 = B * ti * tj * H * 4
    blk_bytes = (2 * B * ti * H * io_isz + 2 * B * tj * H * io_isz
                 + 2 * B * ti * tj * H * out_isz + 3 * face_f32)
    vmem_limit = int(min(0.9 * vmem_phys, max(16 << 20, blk_bytes + (2 << 20))))

    packed = pl.pallas_call(
        functools.partial(_handshake_kernel, tj),
        out_shape=jax.ShapeDtypeStruct((B, nb * ti, tj * H), out_dtype),
        grid_spec=pltpu.PrefetchScalarGridSpec(
            num_scalar_prefetch=2,
            grid=(nb,),
            in_specs=[
                pl.BlockSpec((B, ti, H), lambda t, ib, jb: (0, ib[t], 0)),
                pl.BlockSpec((B, tj * H), lambda t, ib, jb: (0, jb[t])),
            ],
            out_specs=pl.BlockSpec((B, ti, tj * H), lambda t, ib, jb: (0, t, 0)),
        ),
        compiler_params=pltpu.CompilerParams(
            dimension_semantics=("parallel",),   # equal-work blocks -> balanced on v7x 2 TCs
            vmem_limit_bytes=vmem_limit),
        cost_estimate=pl.CostEstimate(
            flops=nb * B * ti * tj * H,
            transcendentals=nb * B * ti * tj * H,
            bytes_accessed=int(io_isz * nb * B * (ti + tj) * H
                               + out_isz * nb * B * ti * tj * H)),
    )(jnp.asarray(ib_tbl), jnp.asarray(jb_tbl), p1, p2f)

    # ---- block-packed -> (B, T, H) triangular layout (torch loop order) ---------------
    # TODO(synk): emitting the ragged (B, T, H) layout directly from the kernel needs dynamic
    # non-8-aligned stores on the packed second-minor dim (unsupported by Mosaic); the gather
    # below reads only the upper-trapezoid blocks (~half the dense face), not a dense S*S face.
    # TODO(synk): for very large B, move the batch dim into the grid (block (1, ti, H)) so
    # ti/tj can grow further; diagonal blocks still compute (never-read) j<i entries.
    iu, ju = np.triu_indices(S)
    t_idx = jnp.asarray(block_id[iu // ti, ju // tj].astype(np.int32))
    li = jnp.asarray((iu % ti).astype(np.int32))
    lj = jnp.asarray((ju % tj).astype(np.int32))
    packed5 = packed.reshape(B, nb, ti, tj, H)            # free (minor-dim split) reshape
    return packed5[:, t_idx, li, lj, :]                   # (B, T, H)


def handshaking_cat_reference(seq_hiddens, weight, bias):
    """Pure-JAX transcription of the PyTorch forward (shaking_type='cat')."""
    B, S, H = seq_hiddens.shape
    outs = []
    for ind in range(S):
        hidden_each_step = seq_hiddens[:, ind, :]
        visible = seq_hiddens[:, ind:, :]
        repeat = jnp.broadcast_to(hidden_each_step[:, None, :], (B, S - ind, H))
        x = jnp.concatenate([repeat, visible], axis=-1)           # (B, S-ind, 2H)
        y = jnp.tanh(jnp.einsum("bsk,hk->bsh", x, weight) + bias)
        outs.append(y)
    return jnp.concatenate(outs, axis=1)


if __name__ == "__main__":
    B, S, H = 2, 8, 32

    key = jax.random.PRNGKey(0)
    k_seq, k_w, k_b = jax.random.split(key, 3)

    seq_hiddens = jax.random.normal(k_seq, (B, S, H), dtype=jnp.float32)
    # nn.Linear(2H, H): weight (H, 2H), bias (H,), uniform(-1/sqrt(2H), 1/sqrt(2H))
    bound = 1.0 / math.sqrt(2.0 * H)
    weight = jax.random.uniform(k_w, (H, 2 * H), jnp.float32, minval=-bound, maxval=bound)
    bias = jax.random.uniform(k_b, (H,), jnp.float32, minval=-bound, maxval=bound)

    n_tri = S * (S + 1) // 2
    ref = handshaking_cat_reference(seq_hiddens, weight, bias)

    # 1) f32, single-block fast path.
    out = jax.block_until_ready(handshaking_cat(seq_hiddens, weight, bias))
    assert out.shape == (B, n_tri, H), out.shape
    assert jnp.allclose(out, ref, atol=1e-5, rtol=1e-5), "f32 mismatch vs reference"

    # 2) f32, non-divisible S with forced small tiles: exercises edge-padded blocks,
    #    lower-triangle block skipping and the block-packed gather.
    S2 = 13
    seq2 = jax.random.normal(jax.random.PRNGKey(1), (B, S2, H), dtype=jnp.float32)
    out2 = jax.block_until_ready(handshaking_cat(seq2, weight, bias, tile_i=8, tile_j=8))
    ref2 = handshaking_cat_reference(seq2, weight, bias)
    assert out2.shape == (B, S2 * (S2 + 1) // 2, H), out2.shape
    assert jnp.allclose(out2, ref2, atol=1e-5, rtol=1e-5), "f32 edge-tile mismatch vs reference"

    # 3) bf16 end-to-end: bf16 MXU operands (f32 accumulate), bf16 p1/p2, bf16 packed output.
    out_bf = jax.block_until_ready(handshaking_cat(seq_hiddens.astype(jnp.bfloat16), weight, bias))
    assert out_bf.shape == (B, n_tri, H)
    assert out_bf.dtype == jnp.bfloat16
    assert jnp.allclose(out_bf.astype(jnp.float32), ref, atol=3e-2, rtol=3e-2), "bf16 mismatch"

    print("KERNEL_OK")
</pallas_src>

<mosaic_0001>
module attributes {stable_mosaic.version = 11 : i64} {
  func.func @_proj_kernel(%arg0: i32, %arg1: memref<16x32xf32, #tpu.memory_space<vmem>>, %arg2: memref<32x64xf32, #tpu.memory_space<vmem>>, %arg3: memref<1x64xf32, #tpu.memory_space<vmem>>, %arg4: memref<16x32xf32, #tpu.memory_space<vmem>>, %arg5: memref<16x32xf32, #tpu.memory_space<vmem>>) attributes {dimension_semantics = [#tpu.dimension_semantics<parallel>], iteration_bounds = array<i64: 1>, scalar_prefetch = 0 : i64, scratch_operands = 0 : i64, tpu.core_type = #tpu.core_type<tc>, window_params = [{transform_indices = @transform_0, window_bounds = array<i64: 16, 32>}, {pipeline_mode = #tpu.pipeline_mode<synchronous>, transform_indices = @transform_1, window_bounds = array<i64: 32, 64>}, {pipeline_mode = #tpu.pipeline_mode<synchronous>, transform_indices = @transform_2, window_bounds = array<i64: 1, 64>}, {transform_indices = @transform_3, window_bounds = array<i64: 16, 32>}, {transform_indices = @transform_4, window_bounds = array<i64: 16, 32>}]} {
    %c0 = arith.constant 0 : index
    %c0_0 = arith.constant 0 : index
    %0 = vector.load %arg1[%c0, %c0_0] : memref<16x32xf32, #tpu.memory_space<vmem>>, vector<16x32xf32>
    %c0_1 = arith.constant 0 : index
    %c0_2 = arith.constant 0 : index
    %1 = vector.load %arg2[%c0_1, %c0_2] : memref<32x64xf32, #tpu.memory_space<vmem>>, vector<32x64xf32>
    %cst = arith.constant dense<0.000000e+00> : vector<16x64xf32>
    %2 = tpu.matmul %0, %1, %cst {dimension_numbers = #tpu.dot_dimension_numbers<[1], [0], [0], [1], [0, 0, 1, 1], [], []>} : vector<16x32xf32>, vector<32x64xf32>, vector<16x64xf32> -> vector<16x64xf32>
    %c0_3 = arith.constant 0 : index
    %c0_4 = arith.constant 0 : index
    %3 = vector.load %arg3[%c0_3, %c0_4] : memref<1x64xf32, #tpu.memory_space<vmem>>, vector<1x64xf32>
    %4 = vector.broadcast %3 : vector<1x64xf32> to vector<16x64xf32>
    %5 = arith.addf %2, %4 : vector<16x64xf32>
    %6 = vector.extract_strided_slice %5 {offsets = [0, 0], sizes = [16, 32], strides = [1, 1]} : vector<16x64xf32> to vector<16x32xf32>
    %c0_5 = arith.constant 0 : index
    %c0_6 = arith.constant 0 : index
    %7 = vector.load %arg4[%c0_5, %c0_6] : memref<16x32xf32, #tpu.memory_space<vmem>>, vector<16x32xf32>
    tpu.vector_store %arg4[%c0_5, %c0_6], %6 {strides = array<i32>} : memref<16x32xf32, #tpu.memory_space<vmem>>, vector<16x32xf32>,
    %8 = vector.extract_strided_slice %5 {offsets = [0, 32], sizes = [16, 32], strides = [1, 1]} : vector<16x64xf32> to vector<16x32xf32>
    %c0_7 = arith.constant 0 : index
    %c0_8 = arith.constant 0 : index
    %9 = vector.load %arg5[%c0_7, %c0_8] : memref<16x32xf32, #tpu.memory_space<vmem>>, vector<16x32xf32>
    tpu.vector_store %arg5[%c0_7, %c0_8], %8 {strides = array<i32>} : memref<16x32xf32, #tpu.memory_space<vmem>>, vector<16x32xf32>,
    return
  }
  func.func @transform_0(%arg0: i32) -> (i32, i32) {
    %c0_i32 = arith.constant 0 : i32
    %c0_i32_0 = arith.constant 0 : i32
    return %arg0, %c0_i32 : i32, i32
  }
  func.func @transform_1(%arg0: i32) -> (i32, i32) {
    %c0_i32 = arith.constant 0 : i32
    %c0_i32_0 = arith.constant 0 : i32
    %c0_i32_1 = arith.constant 0 : i32
    return %c0_i32, %c0_i32_0 : i32, i32
  }
  func.func @transform_2(%arg0: i32) -> (i32, i32) {
    %c0_i32 = arith.constant 0 : i32
    %c0_i32_0 = arith.constant 0 : i32
    %c0_i32_1 = arith.constant 0 : i32
    return %c0_i32, %c0_i32_0 : i32, i32
  }
  func.func @transform_3(%arg0: i32) -> (i32, i32) {
    %c0_i32 = arith.constant 0 : i32
    %c0_i32_0 = arith.constant 0 : i32
    return %arg0, %c0_i32 : i32, i32
  }
  func.func @transform_4(%arg0: i32) -> (i32, i32) {
    %c0_i32 = arith.constant 0 : i32
    %c0_i32_0 = arith.constant 0 : i32
    return %arg0, %c0_i32 : i32, i32
  }
}

</mosaic_0001>

<bundles_post_ra>
// kernel: tpu_custom_call.1
= control target key start
LH: loop header
LB: loop body
LE: loop exit
PB: predicated region body
PF: predicated region fallthrough
CT: control target
= control target key end

     0   :  { %10 = vsyncpa [#allocation3], 0  ;;  %s323_s0 = inlined_call_operand.hbm [shape: f32[16,32], index: 0, kind: input, shape index: {}]   ;;  %s324_s1 = inlined_call_operand.hbm [shape: f32[32,64], index: 1, kind: input, shape index: {}]   ;;  %s325_s2 = inlined_call_operand.vmem [shape: f32[1,64], index: 2, kind: input, shape index: {}]   ;;  %s326_s3 = inlined_call_operand.hbm [shape: f32[16,32], index: 3, kind: output, shape index: {0}]   ;;  %s327_s4 = inlined_call_operand.hbm [shape: f32[16,32], index: 4, kind: output, shape index: {1}]  }
   0x1   :  { %11 = vsyncpa [#allocation6], 0 }
   0x2   :  { %12 = vsyncpa [#allocation4], 0 }
   0x3   :  { %13 = vsyncpa [#allocation9], 0  ;;  %s18_s17 = sshll.u32 %s323_s0, 4  ;;  %s258_s18 = smov [#allocation2]   ;;  %s19_s17 = int_to_ptr.hbm [resolvable:$true] %s18_s17 }
   0x4   :  { %s20_s19 = sshll.u32 %s258_s18, 4  ;;  %s31_s22 = sshll.u32 %s324_s1, 4  ;;  %s21_s19 = int_to_ptr.vmem [resolvable:$true] %s20_s19  ;;  %s32_s22 = int_to_ptr.hbm [resolvable:$true] %s31_s22 }
   0x5   :  { %s259_s23 = smov 128   ;;  %s260_s24 = smov 8  }
   0x6   :  { %26 = dma.hbm_to_vmem [thread:$0]  %s19_s17, 256, %s21_s19, [#allocation3], %s259_s23, %s259_s23, %s260_s24  }
   0x7   :  { %s261_s25 = smov [#allocation5]  }
   0x8   :  { %s33_s26 = sshll.u32 %s261_s25, 4  ;;  %s34_s26 = int_to_ptr.vmem [resolvable:$true] %s33_s26 }
   0x9   :  { %39 = dma.hbm_to_vmem [thread:$0]  %s32_s22, 512, %s34_s26, [#allocation6], %s259_s23, %s259_s23, %s260_s24  }
   0xa   :  { %250 = dma.done.wait [#allocation3], 256  }
   0xb   :  { %251 = vsyncadd [#allocation3], 4294967040 }
   0xc   :  { %252 = dma.done.wait [#allocation6], 512  }
   0xd   :  { %253 = vsyncadd [#allocation6], 4294966784  ;;  %v55_v0 = vld [vmem:[#allocation5 + $0x18] sm:$0xff]  ;;  %v54_v1 = vld [vmem:[#allocation5 + $0x10] sm:$0xff]  ;;  %vm60_vm0 = vcmask 261120   ;;  %s262_s27 = smov [#allocation7]  }
   0xe   :  { %79 = vmatpush.msra.mxu0 %v55_v0  ;;  %142 = vmatpush.msra.mxu1 %v55_v0  ;;  %v53_v2 = vld [vmem:[#allocation5 + $0x8] sm:$0xff]  ;;  %v52_v3 = vld [vmem:[#allocation5] sm:$0xff]  ;;  %v50_v4 = vld [vmem:[#allocation2] sm:$0xff]  ;;  %s106_s28 = sshll.u32 %s262_s27, 4  ;;  %s108_s5 = sshll.u32 %s326_s3, 4  ;;  %s107_s28 = int_to_ptr.vmem [resolvable:$true] %s106_s28  ;;  %s109_s5 = int_to_ptr.hbm [resolvable:$true] %s108_s5 }
   0xf   :  { %v51_v5 = vld [vmem:[#allocation2 + $0x8] sm:$0xff]  ;;  %v153_v6 = vld [vmem:[%s325_s2] ss:$0 sm:$0xff]  ;;  %s263_s6 = smov 96   ;;  %s264_s2 = smov [#allocation8]  }
  0x10   :  { %80 = vmatpush.msra.mxu0 %v54_v1  ;;  %143 = vmatpush.msra.mxu1 %v54_v1  ;;  %s119_s3 = sshll.u32 %s264_s2, 4  ;;  %s121_s9 = sshll.u32 %s327_s4, 4  ;;  %s120_s3 = int_to_ptr.vmem [resolvable:$true] %s119_s3  ;;  %s122_s9 = int_to_ptr.hbm [resolvable:$true] %s121_s9 }
  0x12   :  { %81 = vmatpush.msra.mxu0 %v53_v2  ;;  %144 = vmatpush.msra.mxu1 %v53_v2 }
  0x14   :  { %82 = vmatpush.msra.mxu0 %v52_v3  ;;  %145 = vmatpush.msra.mxu1 %v52_v3 }
  0x15   :  { %140 = vmatmul.msk.f32.vlgmr.msra.gmra.mxu0 %vm60_vm0, %v50_v4  ;;  %141 = vmatmul.msk.f32.vlgmr.msra.gmra.mxu1 %vm60_vm0, %v51_v5 }
  0x92   :  { %v84_v7 = vpop.f32.mrf.mxu0  ;;  %v87_v8 = vpop.f32.mrf.mxu1 }
  0x93   :  { %v85_v9 = vadd.f32 %v153_v6, %v84_v7  ;;  %v88_v10 = vadd.f32 %v153_v6, %v87_v8 }
  0x95   :  { %90 = vst.msk [vmem:[#allocation7] sm:$0xff] %vm60_vm0, %v85_v9  ;;  %94 = vrot.lane.b32.xlu0 %v85_v9, %s263_s6 }
  0x96   :  { %91 = vst.msk [vmem:[#allocation7 + $0x8] sm:$0xff] %vm60_vm0, %v88_v10 }
  0x97   :  { %114 = dma.vmem_to_hbm [thread:$0]  %s107_s28, 256, %s109_s5, [#allocation4], %s259_s23, %s259_s23, %s260_s24  }
  0x9d   :  { %96 = vrot.lane.b32.xlu0 %v88_v10, %s263_s6 }
 0x107   :  { %v95_v11 = vpop.permute.xlu0 %94 }
 0x108   :  { %100 = vst.msk [vmem:[#allocation8] sm:$0xff] %vm60_vm0, %v95_v11 }
 0x10f   :  { %v97_v12 = vpop.permute.xlu0 %96 }
 0x110   :  { %101 = vst.msk [vmem:[#allocation8 + $0x8] sm:$0xff] %vm60_vm0, %v97_v12 }
 0x111   :  { %127 = dma.vmem_to_hbm [thread:$0]  %s120_s3, 256, %s122_s9, [#allocation9], %s259_s23, %s259_s23, %s260_s24  }
 0x112   :  { %254 = dma.done.wait [#allocation4], 256  }
 0x113   :  { %255 = vsyncadd [#allocation4], 4294967040 }
 0x114   :  { %256 = dma.done.wait [#allocation9], 256  }
 0x115   :  { %257 = vsyncadd [#allocation9], 4294967040 }
 0x116   :  { %136 = vsyncpa [#allocation3], 1 }
 0x117   :  { %137 = vsyncpa [#allocation6], 1 }
 0x118   :  { %138 = vsyncpa [#allocation4], 1 }
 0x119   :  { %139 = vsyncpa [#allocation9], 1 }

</bundles_post_ra>
